<compile_context>
chip_gen: v7x
topology: tpu7x:2x2x1
jax: 0.10.0
libtpu: 0.0.40
codegen_flags: <defaults>
</compile_context>

<pallas_src>
import functools

import jax
import jax.numpy as jnp
from jax import lax
from jax.experimental import pallas as pl
from jax.experimental.pallas import tpu as pltpu


def _make_lstm_kernel(T, B, Hp):
    """Builds the single-invocation LSTM recurrence kernel.

    Kernel refs:
      xw_ref  : (T*B, 4*Hp) time-major input projection + bias (gate order
                [i, f, g, o], each gate padded to Hp lanes)
      whh_ref : (Hp, 4*Hp)  padded W_hh^T
      h_out   : (B, Hp)     final hidden state (padded lanes are zero)
    """

    def kernel(xw_ref, whh_ref, h_out_ref):
        def step(t, carry):
            h, c = carry                                # each (B, Hp) f32
            row = pl.multiple_of(t * B, B)              # sublane-aligned start
            x_proj_t = xw_ref[pl.ds(row, B), :]         # (B, 4*Hp)
            # NOTE: W_hh is read from VMEM inside the step (no whole-weight
            # vreg hoist) -- avoids 64-vreg live range across the unrolled loop.
            gates = x_proj_t + jnp.dot(
                h, whh_ref[...], preferred_element_type=jnp.float32)
            # Each gate occupies a full Hp = 128-lane multiple -> whole vregs.
            i_g = jax.nn.sigmoid(gates[:, 0 * Hp:1 * Hp])
            f_g = jax.nn.sigmoid(gates[:, 1 * Hp:2 * Hp])
            g_g = jnp.tanh(gates[:, 2 * Hp:3 * Hp])
            o_g = jax.nn.sigmoid(gates[:, 3 * Hp:4 * Hp])
            c_new = f_g * c + i_g * g_g
            h_new = o_g * jnp.tanh(c_new)
            return (h_new, c_new)

        h0 = jnp.zeros((B, Hp), jnp.float32)
        c0 = jnp.zeros((B, Hp), jnp.float32)
        # Full unroll only while T is small; partial unroll keeps the
        # instruction stream / regalloc pressure bounded for long sequences.
        unroll = True if T <= 32 else 4
        h_T, _ = lax.fori_loop(0, T, step, (h0, c0), unroll=unroll)

        h_out_ref[...] = h_T                            # lane-dense (B, Hp)

    return kernel


def prepare_lstm_weights(w_ih, w_hh, b_ih, b_hh):
    """One-time (init-time) weight prep: pad each gate's output block H -> Hp
    and transpose for right-multiplication. Padded lanes have zero weights and
    bias, so the padded portions of h/c stay exactly zero through the
    recurrence.

    PyTorch layout in: w_ih (4H, D), w_hh (4H, H), b_ih/b_hh (4H,).
    Returns wih_p (D, 4*Hp), whh_p (Hp, 4*Hp), bias_p (1, 4*Hp).
    """
    H = w_hh.shape[1]
    D = w_ih.shape[1]
    Hp = ((H + 127) // 128) * 128                       # pad each gate to 128 lanes

    wih_g = jnp.transpose(w_ih.reshape(4, H, D), (0, 2, 1))        # (4, D, H)
    wih_p = jnp.pad(wih_g, ((0, 0), (0, 0), (0, Hp - H)))
    wih_p = jnp.transpose(wih_p, (1, 0, 2)).reshape(D, 4 * Hp)     # (D, 4*Hp)

    whh_g = jnp.transpose(w_hh.reshape(4, H, H), (0, 2, 1))        # (4, Hin, Hout)
    whh_p = jnp.pad(whh_g, ((0, 0), (0, Hp - H), (0, Hp - H)))
    whh_p = jnp.transpose(whh_p, (1, 0, 2)).reshape(Hp, 4 * Hp)    # (Hp, 4*Hp)

    bias = (b_ih + b_hh).reshape(4, H)
    bias_p = jnp.pad(bias, ((0, 0), (0, Hp - H))).reshape(1, 4 * Hp)

    return (jnp.asarray(wih_p, jnp.float32),
            jnp.asarray(whh_p, jnp.float32),
            jnp.asarray(bias_p, jnp.float32))


@functools.partial(jax.jit, donate_argnums=())
def base_lstm_forward(x, wih_p, whh_p, bias_p, w_cls, b_cls):
    """x: (B, T, D) float32; prepared weights from prepare_lstm_weights;
       w_cls: (C, H), b_cls: (C,). Returns (B, C) float32."""
    B, T, D = x.shape
    Hp = whh_p.shape[0]
    H = w_cls.shape[1]

    # --- Input projection done in XLA (same jitted program): K=D=12 underfills
    # the MXU and is off the serial recurrence. Time-major flatten so timestep
    # t occupies contiguous rows [t*B, (t+1)*B).
    x_tm = jnp.transpose(x, (1, 0, 2)).reshape(T * B, D).astype(jnp.float32)
    xw = jnp.dot(x_tm, wih_p, preferred_element_type=jnp.float32) + bias_p

    kernel = _make_lstm_kernel(T, B, Hp)
    h_last_p = pl.pallas_call(
        kernel,
        out_shape=jax.ShapeDtypeStruct((B, Hp), jnp.float32),
        in_specs=[
            pl.BlockSpec(memory_space=pltpu.MemorySpace.VMEM),  # xw (T*B, 4*Hp)
            pl.BlockSpec(memory_space=pltpu.MemorySpace.VMEM),  # W_hh^T padded
        ],
        out_specs=pl.BlockSpec(memory_space=pltpu.MemorySpace.VMEM),
        # Scaling guard: the resident (T*B, 4*Hp) input grows with T*B; raise
        # the scoped-VMEM ceiling explicitly (v5e default is only 16 MiB).
        compiler_params=pltpu.CompilerParams(
            vmem_limit_bytes=32 * 1024 * 1024),
    )(xw, whh_p)

    # Tiny classifier kept in plain XLA on the lane-dense hidden state.
    h_last = h_last_p[:, :H]                            # (B, H)
    return h_last @ w_cls.T + b_cls                     # (B, C)


def _reference_forward(x, w_ih, w_hh, b_ih, b_hh, w_cls, b_cls):
    """Pure-JAX reference of nn.LSTM(batch_first) + Linear on last timestep."""
    B, T, D = x.shape
    H = w_hh.shape[1]
    h = jnp.zeros((B, H), jnp.float32)
    c = jnp.zeros((B, H), jnp.float32)
    for t in range(T):
        g = x[:, t] @ w_ih.T + b_ih + h @ w_hh.T + b_hh
        i = jax.nn.sigmoid(g[:, 0 * H:1 * H])
        f = jax.nn.sigmoid(g[:, 1 * H:2 * H])
        gg = jnp.tanh(g[:, 2 * H:3 * H])
        o = jax.nn.sigmoid(g[:, 3 * H:4 * H])
        c = f * c + i * gg
        h = o * jnp.tanh(c)
    return h @ w_cls.T + b_cls


if __name__ == "__main__":
    # Shapes consistent with the module: input_dim=12, hidden_dim=64,
    # num_classes=2; batch=8, seq=8.
    B, T, D, H, C = 8, 8, 12, 64, 2

    key = jax.random.PRNGKey(0)
    ks = jax.random.split(key, 7)
    scale = 0.1
    x = jax.random.normal(ks[0], (B, T, D), jnp.float32)
    w_ih = scale * jax.random.normal(ks[1], (4 * H, D), jnp.float32)
    w_hh = scale * jax.random.normal(ks[2], (4 * H, H), jnp.float32)
    b_ih = scale * jax.random.normal(ks[3], (4 * H,), jnp.float32)
    b_hh = scale * jax.random.normal(ks[4], (4 * H,), jnp.float32)
    w_cls = scale * jax.random.normal(ks[5], (C, H), jnp.float32)
    b_cls = scale * jax.random.normal(ks[6], (C,), jnp.float32)

    # One-time weight prep (init-time), not on the per-call forward path.
    wih_p, whh_p, bias_p = prepare_lstm_weights(w_ih, w_hh, b_ih, b_hh)
    wih_p, whh_p, bias_p = jax.block_until_ready((wih_p, whh_p, bias_p))

    out = base_lstm_forward(x, wih_p, whh_p, bias_p, w_cls, b_cls)
    out = jax.block_until_ready(out)

    ref = _reference_forward(x, w_ih, w_hh, b_ih, b_hh, w_cls, b_cls)
    assert out.shape == (B, C)
    assert jnp.allclose(out, ref, atol=1e-4, rtol=1e-4), (out, ref)

    print("KERNEL_OK")
</pallas_src>

<mosaic_0001>
module attributes {stable_mosaic.version = 11 : i64} {
  func.func @kernel(%arg0: memref<64x512xf32, #tpu.memory_space<vmem>>, %arg1: memref<128x512xf32, #tpu.memory_space<vmem>>, %arg2: memref<8x128xf32, #tpu.memory_space<vmem>>) attributes {dimension_semantics = [], scalar_prefetch = 0 : i64, scratch_operands = 0 : i64, tpu.core_type = #tpu.core_type<tc>} {
    %cst = arith.constant 0.000000e+00 : f32
    %0 = vector.broadcast %cst : f32 to vector<8x128xf32>
    %cst_0 = arith.constant 0.000000e+00 : f32
    %1 = vector.broadcast %cst_0 : f32 to vector<8x128xf32>
    %c0_i32 = arith.constant 0 : i32
    %c8_i32 = arith.constant 8 : i32
    %2 = arith.muli %c0_i32, %c8_i32 : i32
    %3 = tpu.assume_multiple %2, 8 : i32
    %4 = arith.index_cast %3 : i32 to index
    %c0 = arith.constant 0 : index
    %5 = vector.load %arg0[%4, %c0] : memref<64x512xf32, #tpu.memory_space<vmem>>, vector<8x512xf32>
    %c0_1 = arith.constant 0 : index
    %c0_2 = arith.constant 0 : index
    %6 = vector.load %arg1[%c0_1, %c0_2] : memref<128x512xf32, #tpu.memory_space<vmem>>, vector<128x512xf32>
    %cst_3 = arith.constant dense<0.000000e+00> : vector<8x512xf32>
    %7 = tpu.matmul %0, %6, %cst_3 {dimension_numbers = #tpu.dot_dimension_numbers<[1], [0], [0], [1], [0, 0, 1, 1], [], []>} : vector<8x128xf32>, vector<128x512xf32>, vector<8x512xf32> -> vector<8x512xf32>
    %8 = arith.addf %5, %7 : vector<8x512xf32>
    %9 = vector.extract_strided_slice %8 {offsets = [0, 0], sizes = [8, 128], strides = [1, 1]} : vector<8x512xf32> to vector<8x128xf32>
    %10 = arith.negf %9 : vector<8x128xf32>
    %11 = math.exp %10 : vector<8x128xf32>
    %cst_4 = arith.constant 1.000000e+00 : f32
    %12 = vector.broadcast %cst_4 : f32 to vector<8x128xf32>
    %13 = arith.addf %12, %11 : vector<8x128xf32>
    %14 = arith.divf %12, %13 : vector<8x128xf32>
    %15 = vector.extract_strided_slice %8 {offsets = [0, 128], sizes = [8, 128], strides = [1, 1]} : vector<8x512xf32> to vector<8x128xf32>
    %16 = arith.negf %15 : vector<8x128xf32>
    %17 = math.exp %16 : vector<8x128xf32>
    %cst_5 = arith.constant 1.000000e+00 : f32
    %18 = vector.broadcast %cst_5 : f32 to vector<8x128xf32>
    %19 = arith.addf %18, %17 : vector<8x128xf32>
    %20 = arith.divf %18, %19 : vector<8x128xf32>
    %21 = vector.extract_strided_slice %8 {offsets = [0, 256], sizes = [8, 128], strides = [1, 1]} : vector<8x512xf32> to vector<8x128xf32>
    %22 = math.tanh %21 : vector<8x128xf32>
    %23 = vector.extract_strided_slice %8 {offsets = [0, 384], sizes = [8, 128], strides = [1, 1]} : vector<8x512xf32> to vector<8x128xf32>
    %24 = arith.negf %23 : vector<8x128xf32>
    %25 = math.exp %24 : vector<8x128xf32>
    %cst_6 = arith.constant 1.000000e+00 : f32
    %26 = vector.broadcast %cst_6 : f32 to vector<8x128xf32>
    %27 = arith.addf %26, %25 : vector<8x128xf32>
    %28 = arith.divf %26, %27 : vector<8x128xf32>
    %29 = arith.mulf %20, %1 : vector<8x128xf32>
    %30 = arith.mulf %14, %22 : vector<8x128xf32>
    %31 = arith.addf %29, %30 : vector<8x128xf32>
    %32 = math.tanh %31 : vector<8x128xf32>
    %33 = arith.mulf %28, %32 : vector<8x128xf32>
    %c1_i32 = arith.constant 1 : i32
    %c8_i32_7 = arith.constant 8 : i32
    %34 = arith.muli %c1_i32, %c8_i32_7 : i32
    %35 = tpu.assume_multiple %34, 8 : i32
    %36 = arith.index_cast %35 : i32 to index
    %c0_8 = arith.constant 0 : index
    %37 = vector.load %arg0[%36, %c0_8] : memref<64x512xf32, #tpu.memory_space<vmem>>, vector<8x512xf32>
    %c0_9 = arith.constant 0 : index
    %c0_10 = arith.constant 0 : index
    %38 = vector.load %arg1[%c0_9, %c0_10] : memref<128x512xf32, #tpu.memory_space<vmem>>, vector<128x512xf32>
    %cst_11 = arith.constant dense<0.000000e+00> : vector<8x512xf32>
    %39 = tpu.matmul %33, %38, %cst_11 {dimension_numbers = #tpu.dot_dimension_numbers<[1], [0], [0], [1], [0, 0, 1, 1], [], []>} : vector<8x128xf32>, vector<128x512xf32>, vector<8x512xf32> -> vector<8x512xf32>
    %40 = arith.addf %37, %39 : vector<8x512xf32>
    %41 = vector.extract_strided_slice %40 {offsets = [0, 0], sizes = [8, 128], strides = [1, 1]} : vector<8x512xf32> to vector<8x128xf32>
    %42 = arith.negf %41 : vector<8x128xf32>
    %43 = math.exp %42 : vector<8x128xf32>
    %cst_12 = arith.constant 1.000000e+00 : f32
    %44 = vector.broadcast %cst_12 : f32 to vector<8x128xf32>
    %45 = arith.addf %44, %43 : vector<8x128xf32>
    %46 = arith.divf %44, %45 : vector<8x128xf32>
    %47 = vector.extract_strided_slice %40 {offsets = [0, 128], sizes = [8, 128], strides = [1, 1]} : vector<8x512xf32> to vector<8x128xf32>
    %48 = arith.negf %47 : vector<8x128xf32>
    %49 = math.exp %48 : vector<8x128xf32>
    %cst_13 = arith.constant 1.000000e+00 : f32
    %50 = vector.broadcast %cst_13 : f32 to vector<8x128xf32>
    %51 = arith.addf %50, %49 : vector<8x128xf32>
    %52 = arith.divf %50, %51 : vector<8x128xf32>
    %53 = vector.extract_strided_slice %40 {offsets = [0, 256], sizes = [8, 128], strides = [1, 1]} : vector<8x512xf32> to vector<8x128xf32>
    %54 = math.tanh %53 : vector<8x128xf32>
    %55 = vector.extract_strided_slice %40 {offsets = [0, 384], sizes = [8, 128], strides = [1, 1]} : vector<8x512xf32> to vector<8x128xf32>
    %56 = arith.negf %55 : vector<8x128xf32>
    %57 = math.exp %56 : vector<8x128xf32>
    %cst_14 = arith.constant 1.000000e+00 : f32
    %58 = vector.broadcast %cst_14 : f32 to vector<8x128xf32>
    %59 = arith.addf %58, %57 : vector<8x128xf32>
    %60 = arith.divf %58, %59 : vector<8x128xf32>
    %61 = arith.mulf %52, %31 : vector<8x128xf32>
    %62 = arith.mulf %46, %54 : vector<8x128xf32>
    %63 = arith.addf %61, %62 : vector<8x128xf32>
    %64 = math.tanh %63 : vector<8x128xf32>
    %65 = arith.mulf %60, %64 : vector<8x128xf32>
    %c2_i32 = arith.constant 2 : i32
    %c8_i32_15 = arith.constant 8 : i32
    %66 = arith.muli %c2_i32, %c8_i32_15 : i32
    %67 = tpu.assume_multiple %66, 8 : i32
    %68 = arith.index_cast %67 : i32 to index
    %c0_16 = arith.constant 0 : index
    %69 = vector.load %arg0[%68, %c0_16] : memref<64x512xf32, #tpu.memory_space<vmem>>, vector<8x512xf32>
    %c0_17 = arith.constant 0 : index
    %c0_18 = arith.constant 0 : index
    %70 = vector.load %arg1[%c0_17, %c0_18] : memref<128x512xf32, #tpu.memory_space<vmem>>, vector<128x512xf32>
    %cst_19 = arith.constant dense<0.000000e+00> : vector<8x512xf32>
    %71 = tpu.matmul %65, %70, %cst_19 {dimension_numbers = #tpu.dot_dimension_numbers<[1], [0], [0], [1], [0, 0, 1, 1], [], []>} : vector<8x128xf32>, vector<128x512xf32>, vector<8x512xf32> -> vector<8x512xf32>
    %72 = arith.addf %69, %71 : vector<8x512xf32>
    %73 = vector.extract_strided_slice %72 {offsets = [0, 0], sizes = [8, 128], strides = [1, 1]} : vector<8x512xf32> to vector<8x128xf32>
    %74 = arith.negf %73 : vector<8x128xf32>
    %75 = math.exp %74 : vector<8x128xf32>
    %cst_20 = arith.constant 1.000000e+00 : f32
    %76 = vector.broadcast %cst_20 : f32 to vector<8x128xf32>
    %77 = arith.addf %76, %75 : vector<8x128xf32>
    %78 = arith.divf %76, %77 : vector<8x128xf32>
    %79 = vector.extract_strided_slice %72 {offsets = [0, 128], sizes = [8, 128], strides = [1, 1]} : vector<8x512xf32> to vector<8x128xf32>
    %80 = arith.negf %79 : vector<8x128xf32>
    %81 = math.exp %80 : vector<8x128xf32>
    %cst_21 = arith.constant 1.000000e+00 : f32
    %82 = vector.broadcast %cst_21 : f32 to vector<8x128xf32>
    %83 = arith.addf %82, %81 : vector<8x128xf32>
    %84 = arith.divf %82, %83 : vector<8x128xf32>
    %85 = vector.extract_strided_slice %72 {offsets = [0, 256], sizes = [8, 128], strides = [1, 1]} : vector<8x512xf32> to vector<8x128xf32>
    %86 = math.tanh %85 : vector<8x128xf32>
    %87 = vector.extract_strided_slice %72 {offsets = [0, 384], sizes = [8, 128], strides = [1, 1]} : vector<8x512xf32> to vector<8x128xf32>
    %88 = arith.negf %87 : vector<8x128xf32>
    %89 = math.exp %88 : vector<8x128xf32>
    %cst_22 = arith.constant 1.000000e+00 : f32
    %90 = vector.broadcast %cst_22 : f32 to vector<8x128xf32>
    %91 = arith.addf %90, %89 : vector<8x128xf32>
    %92 = arith.divf %90, %91 : vector<8x128xf32>
    %93 = arith.mulf %84, %63 : vector<8x128xf32>
    %94 = arith.mulf %78, %86 : vector<8x128xf32>
    %95 = arith.addf %93, %94 : vector<8x128xf32>
    %96 = math.tanh %95 : vector<8x128xf32>
    %97 = arith.mulf %92, %96 : vector<8x128xf32>
    %c3_i32 = arith.constant 3 : i32
    %c8_i32_23 = arith.constant 8 : i32
    %98 = arith.muli %c3_i32, %c8_i32_23 : i32
    %99 = tpu.assume_multiple %98, 8 : i32
    %100 = arith.index_cast %99 : i32 to index
    %c0_24 = arith.constant 0 : index
    %101 = vector.load %arg0[%100, %c0_24] : memref<64x512xf32, #tpu.memory_space<vmem>>, vector<8x512xf32>
    %c0_25 = arith.constant 0 : index
    %c0_26 = arith.constant 0 : index
    %102 = vector.load %arg1[%c0_25, %c0_26] : memref<128x512xf32, #tpu.memory_space<vmem>>, vector<128x512xf32>
    %cst_27 = arith.constant dense<0.000000e+00> : vector<8x512xf32>
    %103 = tpu.matmul %97, %102, %cst_27 {dimension_numbers = #tpu.dot_dimension_numbers<[1], [0], [0], [1], [0, 0, 1, 1], [], []>} : vector<8x128xf32>, vector<128x512xf32>, vector<8x512xf32> -> vector<8x512xf32>
    %104 = arith.addf %101, %103 : vector<8x512xf32>
    %105 = vector.extract_strided_slice %104 {offsets = [0, 0], sizes = [8, 128], strides = [1, 1]} : vector<8x512xf32> to vector<8x128xf32>
    %106 = arith.negf %105 : vector<8x128xf32>
    %107 = math.exp %106 : vector<8x128xf32>
    %cst_28 = arith.constant 1.000000e+00 : f32
    %108 = vector.broadcast %cst_28 : f32 to vector<8x128xf32>
    %109 = arith.addf %108, %107 : vector<8x128xf32>
    %110 = arith.divf %108, %109 : vector<8x128xf32>
    %111 = vector.extract_strided_slice %104 {offsets = [0, 128], sizes = [8, 128], strides = [1, 1]} : vector<8x512xf32> to vector<8x128xf32>
    %112 = arith.negf %111 : vector<8x128xf32>
    %113 = math.exp %112 : vector<8x128xf32>
    %cst_29 = arith.constant 1.000000e+00 : f32
    %114 = vector.broadcast %cst_29 : f32 to vector<8x128xf32>
    %115 = arith.addf %114, %113 : vector<8x128xf32>
    %116 = arith.divf %114, %115 : vector<8x128xf32>
    %117 = vector.extract_strided_slice %104 {offsets = [0, 256], sizes = [8, 128], strides = [1, 1]} : vector<8x512xf32> to vector<8x128xf32>
    %118 = math.tanh %117 : vector<8x128xf32>
    %119 = vector.extract_strided_slice %104 {offsets = [0, 384], sizes = [8, 128], strides = [1, 1]} : vector<8x512xf32> to vector<8x128xf32>
    %120 = arith.negf %119 : vector<8x128xf32>
    %121 = math.exp %120 : vector<8x128xf32>
    %cst_30 = arith.constant 1.000000e+00 : f32
    %122 = vector.broadcast %cst_30 : f32 to vector<8x128xf32>
    %123 = arith.addf %122, %121 : vector<8x128xf32>
    %124 = arith.divf %122, %123 : vector<8x128xf32>
    %125 = arith.mulf %116, %95 : vector<8x128xf32>
    %126 = arith.mulf %110, %118 : vector<8x128xf32>
    %127 = arith.addf %125, %126 : vector<8x128xf32>
    %128 = math.tanh %127 : vector<8x128xf32>
    %129 = arith.mulf %124, %128 : vector<8x128xf32>
    %c4_i32 = arith.constant 4 : i32
    %c8_i32_31 = arith.constant 8 : i32
    %130 = arith.muli %c4_i32, %c8_i32_31 : i32
    %131 = tpu.assume_multiple %130, 8 : i32
    %132 = arith.index_cast %131 : i32 to index
    %c0_32 = arith.constant 0 : index
    %133 = vector.load %arg0[%132, %c0_32] : memref<64x512xf32, #tpu.memory_space<vmem>>, vector<8x512xf32>
    %c0_33 = arith.constant 0 : index
    %c0_34 = arith.constant 0 : index
    %134 = vector.load %arg1[%c0_33, %c0_34] : memref<128x512xf32, #tpu.memory_space<vmem>>, vector<128x512xf32>
    %cst_35 = arith.constant dense<0.000000e+00> : vector<8x512xf32>
    %135 = tpu.matmul %129, %134, %cst_35 {dimension_numbers = #tpu.dot_dimension_numbers<[1], [0], [0], [1], [0, 0, 1, 1], [], []>} : vector<8x128xf32>, vector<128x512xf32>, vector<8x512xf32> -> vector<8x512xf32>
    %136 = arith.addf %133, %135 : vector<8x512xf32>
    %137 = vector.extract_strided_slice %136 {offsets = [0, 0], sizes = [8, 128], strides = [1, 1]} : vector<8x512xf32> to vector<8x128xf32>
    %138 = arith.negf %137 : vector<8x128xf32>
    %139 = math.exp %138 : vector<8x128xf32>
    %cst_36 = arith.constant 1.000000e+00 : f32
    %140 = vector.broadcast %cst_36 : f32 to vector<8x128xf32>
    %141 = arith.addf %140, %139 : vector<8x128xf32>
    %142 = arith.divf %140, %141 : vector<8x128xf32>
    %143 = vector.extract_strided_slice %136 {offsets = [0, 128], sizes = [8, 128], strides = [1, 1]} : vector<8x512xf32> to vector<8x128xf32>
    %144 = arith.negf %143 : vector<8x128xf32>
    %145 = math.exp %144 : vector<8x128xf32>
    %cst_37 = arith.constant 1.000000e+00 : f32
    %146 = vector.broadcast %cst_37 : f32 to vector<8x128xf32>
    %147 = arith.addf %146, %145 : vector<8x128xf32>
    %148 = arith.divf %146, %147 : vector<8x128xf32>
    %149 = vector.extract_strided_slice %136 {offsets = [0, 256], sizes = [8, 128], strides = [1, 1]} : vector<8x512xf32> to vector<8x128xf32>
    %150 = math.tanh %149 : vector<8x128xf32>
    %151 = vector.extract_strided_slice %136 {offsets = [0, 384], sizes = [8, 128], strides = [1, 1]} : vector<8x512xf32> to vector<8x128xf32>
    %152 = arith.negf %151 : vector<8x128xf32>
    %153 = math.exp %152 : vector<8x128xf32>
    %cst_38 = arith.constant 1.000000e+00 : f32
    %154 = vector.broadcast %cst_38 : f32 to vector<8x128xf32>
    %155 = arith.addf %154, %153 : vector<8x128xf32>
    %156 = arith.divf %154, %155 : vector<8x128xf32>
    %157 = arith.mulf %148, %127 : vector<8x128xf32>
    %158 = arith.mulf %142, %150 : vector<8x128xf32>
    %159 = arith.addf %157, %158 : vector<8x128xf32>
    %160 = math.tanh %159 : vector<8x128xf32>
    %161 = arith.mulf %156, %160 : vector<8x128xf32>
    %c5_i32 = arith.constant 5 : i32
    %c8_i32_39 = arith.constant 8 : i32
    %162 = arith.muli %c5_i32, %c8_i32_39 : i32
    %163 = tpu.assume_multiple %162, 8 : i32
    %164 = arith.index_cast %163 : i32 to index
    %c0_40 = arith.constant 0 : index
    %165 = vector.load %arg0[%164, %c0_40] : memref<64x512xf32, #tpu.memory_space<vmem>>, vector<8x512xf32>
    %c0_41 = arith.constant 0 : index
    %c0_42 = arith.constant 0 : index
    %166 = vector.load %arg1[%c0_41, %c0_42] : memref<128x512xf32, #tpu.memory_space<vmem>>, vector<128x512xf32>
    %cst_43 = arith.constant dense<0.000000e+00> : vector<8x512xf32>
    %167 = tpu.matmul %161, %166, %cst_43 {dimension_numbers = #tpu.dot_dimension_numbers<[1], [0], [0], [1], [0, 0, 1, 1], [], []>} : vector<8x128xf32>, vector<128x512xf32>, vector<8x512xf32> -> vector<8x512xf32>
    %168 = arith.addf %165, %167 : vector<8x512xf32>
    %169 = vector.extract_strided_slice %168 {offsets = [0, 0], sizes = [8, 128], strides = [1, 1]} : vector<8x512xf32> to vector<8x128xf32>
    %170 = arith.negf %169 : vector<8x128xf32>
    %171 = math.exp %170 : vector<8x128xf32>
    %cst_44 = arith.constant 1.000000e+00 : f32
    %172 = vector.broadcast %cst_44 : f32 to vector<8x128xf32>
    %173 = arith.addf %172, %171 : vector<8x128xf32>
    %174 = arith.divf %172, %173 : vector<8x128xf32>
    %175 = vector.extract_strided_slice %168 {offsets = [0, 128], sizes = [8, 128], strides = [1, 1]} : vector<8x512xf32> to vector<8x128xf32>
    %176 = arith.negf %175 : vector<8x128xf32>
    %177 = math.exp %176 : vector<8x128xf32>
    %cst_45 = arith.constant 1.000000e+00 : f32
    %178 = vector.broadcast %cst_45 : f32 to vector<8x128xf32>
    %179 = arith.addf %178, %177 : vector<8x128xf32>
    %180 = arith.divf %178, %179 : vector<8x128xf32>
    %181 = vector.extract_strided_slice %168 {offsets = [0, 256], sizes = [8, 128], strides = [1, 1]} : vector<8x512xf32> to vector<8x128xf32>
    %182 = math.tanh %181 : vector<8x128xf32>
    %183 = vector.extract_strided_slice %168 {offsets = [0, 384], sizes = [8, 128], strides = [1, 1]} : vector<8x512xf32> to vector<8x128xf32>
    %184 = arith.negf %183 : vector<8x128xf32>
    %185 = math.exp %184 : vector<8x128xf32>
    %cst_46 = arith.constant 1.000000e+00 : f32
    %186 = vector.broadcast %cst_46 : f32 to vector<8x128xf32>
    %187 = arith.addf %186, %185 : vector<8x128xf32>
    %188 = arith.divf %186, %187 : vector<8x128xf32>
    %189 = arith.mulf %180, %159 : vector<8x128xf32>
    %190 = arith.mulf %174, %182 : vector<8x128xf32>
    %191 = arith.addf %189, %190 : vector<8x128xf32>
    %192 = math.tanh %191 : vector<8x128xf32>
    %193 = arith.mulf %188, %192 : vector<8x128xf32>
    %c6_i32 = arith.constant 6 : i32
    %c8_i32_47 = arith.constant 8 : i32
    %194 = arith.muli %c6_i32, %c8_i32_47 : i32
    %195 = tpu.assume_multiple %194, 8 : i32
    %196 = arith.index_cast %195 : i32 to index
    %c0_48 = arith.constant 0 : index
    %197 = vector.load %arg0[%196, %c0_48] : memref<64x512xf32, #tpu.memory_space<vmem>>, vector<8x512xf32>
    %c0_49 = arith.constant 0 : index
    %c0_50 = arith.constant 0 : index
    %198 = vector.load %arg1[%c0_49, %c0_50] : memref<128x512xf32, #tpu.memory_space<vmem>>, vector<128x512xf32>
    %cst_51 = arith.constant dense<0.000000e+00> : vector<8x512xf32>
    %199 = tpu.matmul %193, %198, %cst_51 {dimension_numbers = #tpu.dot_dimension_numbers<[1], [0], [0], [1], [0, 0, 1, 1], [], []>} : vector<8x128xf32>, vector<128x512xf32>, vector<8x512xf32> -> vector<8x512xf32>
    %200 = arith.addf %197, %199 : vector<8x512xf32>
    %201 = vector.extract_strided_slice %200 {offsets = [0, 0], sizes = [8, 128], strides = [1, 1]} : vector<8x512xf32> to vector<8x128xf32>
    %202 = arith.negf %201 : vector<8x128xf32>
    %203 = math.exp %202 : vector<8x128xf32>
    %cst_52 = arith.constant 1.000000e+00 : f32
    %204 = vector.broadcast %cst_52 : f32 to vector<8x128xf32>
    %205 = arith.addf %204, %203 : vector<8x128xf32>
    %206 = arith.divf %204, %205 : vector<8x128xf32>
    %207 = vector.extract_strided_slice %200 {offsets = [0, 128], sizes = [8, 128], strides = [1, 1]} : vector<8x512xf32> to vector<8x128xf32>
    %208 = arith.negf %207 : vector<8x128xf32>
    %209 = math.exp %208 : vector<8x128xf32>
    %cst_53 = arith.constant 1.000000e+00 : f32
    %210 = vector.broadcast %cst_53 : f32 to vector<8x128xf32>
    %211 = arith.addf %210, %209 : vector<8x128xf32>
    %212 = arith.divf %210, %211 : vector<8x128xf32>
    %213 = vector.extract_strided_slice %200 {offsets = [0, 256], sizes = [8, 128], strides = [1, 1]} : vector<8x512xf32> to vector<8x128xf32>
    %214 = math.tanh %213 : vector<8x128xf32>
    %215 = vector.extract_strided_slice %200 {offsets = [0, 384], sizes = [8, 128], strides = [1, 1]} : vector<8x512xf32> to vector<8x128xf32>
    %216 = arith.negf %215 : vector<8x128xf32>
    %217 = math.exp %216 : vector<8x128xf32>
    %cst_54 = arith.constant 1.000000e+00 : f32
    %218 = vector.broadcast %cst_54 : f32 to vector<8x128xf32>
    %219 = arith.addf %218, %217 : vector<8x128xf32>
    %220 = arith.divf %218, %219 : vector<8x128xf32>
    %221 = arith.mulf %212, %191 : vector<8x128xf32>
    %222 = arith.mulf %206, %214 : vector<8x128xf32>
    %223 = arith.addf %221, %222 : vector<8x128xf32>
    %224 = math.tanh %223 : vector<8x128xf32>
    %225 = arith.mulf %220, %224 : vector<8x128xf32>
    %c7_i32 = arith.constant 7 : i32
    %c8_i32_55 = arith.constant 8 : i32
    %226 = arith.muli %c7_i32, %c8_i32_55 : i32
    %227 = tpu.assume_multiple %226, 8 : i32
    %228 = arith.index_cast %227 : i32 to index
    %c0_56 = arith.constant 0 : index
    %229 = vector.load %arg0[%228, %c0_56] : memref<64x512xf32, #tpu.memory_space<vmem>>, vector<8x512xf32>
    %c0_57 = arith.constant 0 : index
    %c0_58 = arith.constant 0 : index
    %230 = vector.load %arg1[%c0_57, %c0_58] : memref<128x512xf32, #tpu.memory_space<vmem>>, vector<128x512xf32>
    %cst_59 = arith.constant dense<0.000000e+00> : vector<8x512xf32>
    %231 = tpu.matmul %225, %230, %cst_59 {dimension_numbers = #tpu.dot_dimension_numbers<[1], [0], [0], [1], [0, 0, 1, 1], [], []>} : vector<8x128xf32>, vector<128x512xf32>, vector<8x512xf32> -> vector<8x512xf32>
    %232 = arith.addf %229, %231 : vector<8x512xf32>
    %233 = vector.extract_strided_slice %232 {offsets = [0, 0], sizes = [8, 128], strides = [1, 1]} : vector<8x512xf32> to vector<8x128xf32>
    %234 = arith.negf %233 : vector<8x128xf32>
    %235 = math.exp %234 : vector<8x128xf32>
    %cst_60 = arith.constant 1.000000e+00 : f32
    %236 = vector.broadcast %cst_60 : f32 to vector<8x128xf32>
    %237 = arith.addf %236, %235 : vector<8x128xf32>
    %238 = arith.divf %236, %237 : vector<8x128xf32>
    %239 = vector.extract_strided_slice %232 {offsets = [0, 128], sizes = [8, 128], strides = [1, 1]} : vector<8x512xf32> to vector<8x128xf32>
    %240 = arith.negf %239 : vector<8x128xf32>
    %241 = math.exp %240 : vector<8x128xf32>
    %cst_61 = arith.constant 1.000000e+00 : f32
    %242 = vector.broadcast %cst_61 : f32 to vector<8x128xf32>
    %243 = arith.addf %242, %241 : vector<8x128xf32>
    %244 = arith.divf %242, %243 : vector<8x128xf32>
    %245 = vector.extract_strided_slice %232 {offsets = [0, 256], sizes = [8, 128], strides = [1, 1]} : vector<8x512xf32> to vector<8x128xf32>
    %246 = math.tanh %245 : vector<8x128xf32>
    %247 = vector.extract_strided_slice %232 {offsets = [0, 384], sizes = [8, 128], strides = [1, 1]} : vector<8x512xf32> to vector<8x128xf32>
    %248 = arith.negf %247 : vector<8x128xf32>
    %249 = math.exp %248 : vector<8x128xf32>
    %cst_62 = arith.constant 1.000000e+00 : f32
    %250 = vector.broadcast %cst_62 : f32 to vector<8x128xf32>
    %251 = arith.addf %250, %249 : vector<8x128xf32>
    %252 = arith.divf %250, %251 : vector<8x128xf32>
    %253 = arith.mulf %244, %223 : vector<8x128xf32>
    %254 = arith.mulf %238, %246 : vector<8x128xf32>
    %255 = arith.addf %253, %254 : vector<8x128xf32>
    %256 = math.tanh %255 : vector<8x128xf32>
    %257 = arith.mulf %252, %256 : vector<8x128xf32>
    %c8_i32_63 = arith.constant 8 : i32
    %c0_64 = arith.constant 0 : index
    %c0_65 = arith.constant 0 : index
    %258 = vector.load %arg2[%c0_64, %c0_65] : memref<8x128xf32, #tpu.memory_space<vmem>>, vector<8x128xf32>
    tpu.vector_store %arg2[%c0_64, %c0_65], %257 {strides = array<i32>} : memref<8x128xf32, #tpu.memory_space<vmem>>, vector<8x128xf32>,
    return
  }
}

</mosaic_0001>

<bundles_post_ra>
// kernel: base_lstm_forward.1
= control target key start
LH: loop header
LB: loop body
LE: loop exit
PB: predicated region body
PF: predicated region fallthrough
CT: control target
= control target key end

     0   :  { %v2196_v3 = vmov 0.0   ;;  %s2865_s1 = inlined_call_operand.vmem [shape: f32[128,512], index: 1, kind: input, shape index: {}]   ;;  %s2866_s0 = inlined_call_operand.vmem [shape: f32[64,512], index: 0, kind: input, shape index: {}]   ;;  %s2867_s2 = inlined_call_operand.vmem [shape: f32[8,128], index: 2, kind: output, shape index: {}]  }
   0x1   :  { %v19_v0 = vld [vmem:[%s2865_s1 + $0x8] sm:$0xff]  ;;  %v18_v2 = vld [vmem:[%s2865_s1] sm:$0xff]  ;;  %146 = vmatprep.mubr.f32.mxu0 %v2196_v3  ;;  %217 = vmatprep.mubr.f32.mxu1 %v2196_v3  ;;  %v21_v19 = vld [vmem:[%s2865_s1 + $0x18] sm:$0xff] }
   0x2   :  { %v23_v1 = vld [vmem:[%s2865_s1 + $0x28] sm:$0xff]  ;;  %v22_v5 = vld [vmem:[%s2865_s1 + $0x20] sm:$0xff]  ;;  %v25_v20 = vld [vmem:[%s2865_s1 + $0x38] sm:$0xff] }
   0x3   :  { %v2223_v4 = vpack.c.bf16 %v23_v1, %v19_v0  ;;  %v27_v6 = vld [vmem:[%s2865_s1 + $0x48] sm:$0xff]  ;;  %v2234_v8 = vpack.c.bf16 %v22_v5, %v18_v2  ;;  %v26_v10 = vld [vmem:[%s2865_s1 + $0x40] sm:$0xff]  ;;  %v2275_v22 = vpack.c.bf16 %v25_v20, %v21_v19  ;;  %v20_v23 = vld [vmem:[%s2865_s1 + $0x10] sm:$0xff] }
   0x4   :  { %v31_v7 = vld [vmem:[%s2865_s1 + $0x68] sm:$0xff]  ;;  %v30_v11 = vld [vmem:[%s2865_s1 + $0x60] sm:$0xff]  ;;  %v24_v24 = vld [vmem:[%s2865_s1 + $0x30] sm:$0xff] }
   0x5   :  { %v2236_v9 = vpack.c.bf16 %v31_v7, %v27_v6  ;;  %v35_v12 = vld [vmem:[%s2865_s1 + $0x88] sm:$0xff]  ;;  %1556 = vmatprep.subr.bf16.mxu0 %v2223_v4  ;;  %v2252_v14 = vpack.c.bf16 %v30_v11, %v26_v10  ;;  %v34_v15 = vld [vmem:[%s2865_s1 + $0x80] sm:$0xff]  ;;  %v2283_v25 = vpack.c.bf16 %v24_v24, %v20_v23  ;;  %1588 = vmatprep.subr.bf16.mxu1 %v2275_v22  ;;  %v29_v27 = vld [vmem:[%s2865_s1 + $0x58] sm:$0xff] }
   0x6   :  { %v39_v13 = vld [vmem:[%s2865_s1 + $0xa8] sm:$0xff]  ;;  %1558 = vmatpush1.bf16.msra.mxu0 %v2234_v8  ;;  %v38_v16 = vld [vmem:[%s2865_s1 + $0xa0] sm:$0xff]  ;;  %v33_v28 = vld [vmem:[%s2865_s1 + $0x78] sm:$0xff] }
   0x7   :  { %1560 = vmatprep.subr.bf16.mxu0 %v2236_v9  ;;  %v2261_v17 = vpack.c.bf16 %v39_v13, %v35_v12  ;;  %v43_v18 = vld [vmem:[%s2865_s1 + $0xc8] sm:$0xff]  ;;  %v2286_v26 = vpack.c.bf16 %v38_v16, %v34_v15  ;;  %v28_v29 = vld [vmem:[%s2865_s1 + $0x50] sm:$0xff]  ;;  %v42_v31 = vld [vmem:[%s2865_s1 + $0xc0] sm:$0xff]  ;;  %1590 = vmatpush1.bf16.msra.mxu1 %v2283_v25  ;;  %v2308_v33 = vpack.c.bf16 %v33_v28, %v29_v27 }
   0x8   :  { %v47_v21 = vld [vmem:[%s2865_s1 + $0xe8] sm:$0xff]  ;;  %v46_v32 = vld [vmem:[%s2865_s1 + $0xe0] sm:$0xff]  ;;  %v32_v34 = vld [vmem:[%s2865_s1 + $0x70] sm:$0xff] }
   0x9   :  { %v2299_v30 = vpack.c.bf16 %v47_v21, %v43_v18  ;;  %v51_v35 = vld [vmem:[%s2865_s1 + $0x108] sm:$0xff]  ;;  %v2319_v37 = vpack.c.bf16 %v32_v34, %v28_v29  ;;  %v37_v38 = vld [vmem:[%s2865_s1 + $0x98] sm:$0xff]  ;;  %1592 = vmatprep.subr.bf16.mxu1 %v2308_v33  ;;  %v36_v40 = vld [vmem:[%s2865_s1 + $0x90] sm:$0xff]  ;;  %v2335_v42 = vpack.c.bf16 %v46_v32, %v42_v31 }
   0xa   :  { %1562 = vmatpush1.bf16.msra.mxu0 %v2252_v14  ;;  %v55_v36 = vld [vmem:[%s2865_s1 + $0x128] sm:$0xff]  ;;  %v41_v39 = vld [vmem:[%s2865_s1 + $0xb8] sm:$0xff]  ;;  %v40_v41 = vld [vmem:[%s2865_s1 + $0xb0] sm:$0xff] }
   0xb   :  { %1564 = vmatprep.subr.bf16.mxu0 %v2261_v17  ;;  %v50_v43 = vld [vmem:[%s2865_s1 + $0x100] sm:$0xff]  ;;  %v2343_v45 = vpack.c.bf16 %v41_v39, %v37_v38  ;;  %v2346_v46 = vpack.c.bf16 %v55_v36, %v51_v35  ;;  %1594 = vmatpush1.bf16.msra.mxu1 %v2319_v37  ;;  %v59_v47 = vld [vmem:[%s2865_s1 + $0x148] sm:$0xff]  ;;  %v2352_v48 = vpack.c.bf16 %v40_v41, %v36_v40  ;;  %v45_v49 = vld [vmem:[%s2865_s1 + $0xd8] sm:$0xff] }
   0xc   :  { %v54_v44 = vld [vmem:[%s2865_s1 + $0x120] sm:$0xff]  ;;  %v49_v50 = vld [vmem:[%s2865_s1 + $0xf8] sm:$0xff]  ;;  %v63_v51 = vld [vmem:[%s2865_s1 + $0x168] sm:$0xff] }
   0xd   :  { %1596 = vmatprep.subr.bf16.mxu1 %v2343_v45  ;;  %v2364_v52 = vpack.c.bf16 %v49_v50, %v45_v49  ;;  %v44_v53 = vld [vmem:[%s2865_s1 + $0xd0] sm:$0xff]  ;;  %v2373_v55 = vpack.c.bf16 %v54_v44, %v50_v43  ;;  %v53_v56 = vld [vmem:[%s2865_s1 + $0x118] sm:$0xff]  ;;  %v2382_v58 = vpack.c.bf16 %v63_v51, %v59_v47  ;;  %v58_v59 = vld [vmem:[%s2865_s1 + $0x140] sm:$0xff] }
   0xe   :  { %1566 = vmatpush1.bf16.msra.mxu0 %v2286_v26  ;;  %v48_v54 = vld [vmem:[%s2865_s1 + $0xf0] sm:$0xff]  ;;  %v57_v57 = vld [vmem:[%s2865_s1 + $0x138] sm:$0xff]  ;;  %v62_v60 = vld [vmem:[%s2865_s1 + $0x160] sm:$0xff] }
   0xf   :  { %1568 = vmatprep.subr.bf16.mxu0 %v2299_v30  ;;  %1598 = vmatpush1.bf16.msra.mxu1 %v2352_v48  ;;  %v67_v61 = vld [vmem:[%s2865_s1 + $0x188] sm:$0xff]  ;;  %v2394_v62 = vpack.c.bf16 %v48_v54, %v44_v53  ;;  %v2400_v0 = vpack.c.bf16 %v57_v57, %v53_v56  ;;  %v52_v1 = vld [vmem:[%s2865_s1 + $0x110] sm:$0xff]  ;;  %v61_v5 = vld [vmem:[%s2865_s1 + $0x158] sm:$0xff]  ;;  %v2415_v7 = vpack.c.bf16 %v62_v60, %v58_v59 }
  0x10   :  { %v71_v63 = vld [vmem:[%s2865_s1 + $0x1a8] sm:$0xff]  ;;  %1600 = vmatprep.subr.bf16.mxu1 %v2364_v52  ;;  %v56_v2 = vld [vmem:[%s2865_s1 + $0x130] sm:$0xff]  ;;  %v65_v6 = vld [vmem:[%s2865_s1 + $0x178] sm:$0xff] }
  0x11   :  { %v2418_v10 = vpack.c.bf16 %v71_v63, %v67_v61  ;;  %v66_v11 = vld [vmem:[%s2865_s1 + $0x180] sm:$0xff]  ;;  %v75_v13 = vld [vmem:[%s2865_s1 + $0x1c8] sm:$0xff]  ;;  %v2430_v15 = vpack.c.bf16 %v56_v2, %v52_v1  ;;  %v2436_v18 = vpack.c.bf16 %v65_v6, %v61_v5  ;;  %v60_v19 = vld [vmem:[%s2865_s1 + $0x150] sm:$0xff] }
  0x12   :  { %1570 = vmatpush1.bf16.msra.mxu0 %v2335_v42  ;;  %v70_v12 = vld [vmem:[%s2865_s1 + $0x1a0] sm:$0xff]  ;;  %v79_v16 = vld [vmem:[%s2865_s1 + $0x1e8] sm:$0xff]  ;;  %v64_v20 = vld [vmem:[%s2865_s1 + $0x170] sm:$0xff] }
  0x13   :  { %1572 = vmatprep.subr.bf16.mxu0 %v2346_v46  ;;  %1602 = vmatpush1.bf16.msra.mxu1 %v2394_v62  ;;  %v69_v21 = vld [vmem:[%s2865_s1 + $0x198] sm:$0xff]  ;;  %v2451_v24 = vpack.c.bf16 %v70_v12, %v66_v11  ;;  %v2454_v27 = vpack.c.bf16 %v79_v16, %v75_v13  ;;  %v74_v28 = vld [vmem:[%s2865_s1 + $0x1c0] sm:$0xff]  ;;  %v2463_v31 = vpack.c.bf16 %v64_v20, %v60_v19  ;;  %v68_v34 = vld [vmem:[%s2865_s1 + $0x190] sm:$0xff] }
  0x14   :  { %1604 = vmatprep.subr.bf16.mxu1 %v2400_v0  ;;  %v73_v23 = vld [vmem:[%s2865_s1 + $0x1b8] sm:$0xff]  ;;  %v78_v29 = vld [vmem:[%s2865_s1 + $0x1e0] sm:$0xff]  ;;  %v72_v35 = vld [vmem:[%s2865_s1 + $0x1b0] sm:$0xff] }
  0x15   :  { %v2466_v32 = vpack.c.bf16 %v73_v23, %v69_v21  ;;  %v77_v36 = vld [vmem:[%s2865_s1 + $0x1d8] sm:$0xff]  ;;  %v2481_v39 = vpack.c.bf16 %v78_v29, %v74_v28  ;;  %v2485_v40 = vpack.c.bf16 %v72_v35, %v68_v34  ;;  %v76_v43 = vld [vmem:[%s2865_s1 + $0x1d0] sm:$0xff]  ;;  %v14_v49 = vld [vmem:[%s2866_s0] sm:$0xff] }
  0x16   :  { %1574 = vmatpush1.bf16.msra.mxu0 %v2373_v55  ;;  %v81_v38 = vld [vmem:[%s2865_s1 + $0x1f8] sm:$0xff]  ;;  %v80_v44 = vld [vmem:[%s2865_s1 + $0x1f0] sm:$0xff]  ;;  %v15_v50 = vld [vmem:[%s2866_s0 + $0x8] sm:$0xff] }
  0x17   :  { %1576 = vmatprep.subr.bf16.mxu0 %v2382_v58  ;;  %1606 = vmatpush1.bf16.msra.mxu1 %v2430_v15  ;;  %v2488_v41 = vpack.c.bf16 %v81_v38, %v77_v36  ;;  %v2498_v47 = vpack.c.bf16 %v80_v44, %v76_v43  ;;  %v17_v60 = vld [vmem:[%s2866_s0 + $0x18] sm:$0xff]  ;;  %v16_v2 = vld [vmem:[%s2866_s0 + $0x10] sm:$0xff]  ;;  %v1506_v44 = vld [vmem:[%s2866_s0 + $0x20] sm:$0xff] }
  0x18   :  { %1608 = vmatprep.subr.bf16.mxu1 %v2436_v18 }
  0x1a   :  { %1578 = vmatpush1.bf16.msra.mxu0 %v2415_v7 }
  0x1b   :  { %1580 = vmatprep.subr.bf16.mxu0 %v2418_v10  ;;  %1610 = vmatpush1.bf16.msra.mxu1 %v2463_v31 }
  0x1c   :  { %1612 = vmatprep.subr.bf16.mxu1 %v2466_v32 }
  0x1e   :  { %1582 = vmatpush1.bf16.msra.mxu0 %v2451_v24 }
  0x1f   :  { %1584 = vmatprep.subr.bf16.mxu0 %v2454_v27  ;;  %1614 = vmatpush1.bf16.msra.mxu1 %v2485_v40 }
  0x20   :  { %1616 = vmatprep.subr.bf16.mxu1 %v2488_v41 }
  0x22   :  { %1586 = vmatpush1.bf16.msra.mxu0 %v2481_v39 }
  0x23   :  { %1620 = vmatprep.subr.bf16.mxu0 %v2223_v4  ;;  %1618 = vmatpush1.bf16.msra.mxu1 %v2498_v47 }
  0x24   :  { %1652 = vmatprep.subr.bf16.mxu1 %v2275_v22 }
  0x25   :  { %147 = vmatmul.mubr.f32.vlgmr.msra.gmra.mrb[0].mxu0 %v2196_v3 }
  0x26   :  { %1622 = vmatpush1.bf16.msra.mxu0 %v2234_v8  ;;  %323 = vmatprep.mubr.f32.mxu0 %v2196_v3 }
  0x27   :  { %1624 = vmatprep.subr.bf16.mxu0 %v2236_v9  ;;  %218 = vmatmul.mubr.f32.vlgmr.msra.gmra.mrb[0].mxu1 %v2196_v3 }
  0x28   :  { %1654 = vmatpush1.bf16.msra.mxu1 %v2283_v25  ;;  %394 = vmatprep.mubr.f32.mxu1 %v2196_v3 }
  0x29   :  { %1656 = vmatprep.subr.bf16.mxu1 %v2308_v33 }
  0x2a   :  { %1626 = vmatpush1.bf16.msra.mxu0 %v2252_v14 }
  0x2b   :  { %1628 = vmatprep.subr.bf16.mxu0 %v2261_v17 }
  0x2c   :  { %1658 = vmatpush1.bf16.msra.mxu1 %v2319_v37 }
  0x2d   :  { %1660 = vmatprep.subr.bf16.mxu1 %v2343_v45 }
  0x2e   :  { %1630 = vmatpush1.bf16.msra.mxu0 %v2286_v26 }
  0x2f   :  { %1632 = vmatprep.subr.bf16.mxu0 %v2299_v30 }
  0x30   :  { %1662 = vmatpush1.bf16.msra.mxu1 %v2352_v48 }
  0x31   :  { %1664 = vmatprep.subr.bf16.mxu1 %v2364_v52 }
  0x32   :  { %1634 = vmatpush1.bf16.msra.mxu0 %v2335_v42 }
  0x33   :  { %1636 = vmatprep.subr.bf16.mxu0 %v2346_v46 }
  0x34   :  { %1666 = vmatpush1.bf16.msra.mxu1 %v2394_v62 }
  0x35   :  { %1668 = vmatprep.subr.bf16.mxu1 %v2400_v0 }
  0x36   :  { %1638 = vmatpush1.bf16.msra.mxu0 %v2373_v55 }
  0x37   :  { %1640 = vmatprep.subr.bf16.mxu0 %v2382_v58 }
  0x38   :  { %1670 = vmatpush1.bf16.msra.mxu1 %v2430_v15 }
  0x39   :  { %1672 = vmatprep.subr.bf16.mxu1 %v2436_v18 }
  0x3a   :  { %1642 = vmatpush1.bf16.msra.mxu0 %v2415_v7 }
  0x3b   :  { %1644 = vmatprep.subr.bf16.mxu0 %v2418_v10 }
  0x3c   :  { %1674 = vmatpush1.bf16.msra.mxu1 %v2463_v31 }
  0x3d   :  { %1676 = vmatprep.subr.bf16.mxu1 %v2466_v32 }
  0x3e   :  { %1646 = vmatpush1.bf16.msra.mxu0 %v2451_v24 }
  0x3f   :  { %1648 = vmatprep.subr.bf16.mxu0 %v2454_v27 }
  0x40   :  { %1678 = vmatpush1.bf16.msra.mxu1 %v2485_v40 }
  0x41   :  { %1680 = vmatprep.subr.bf16.mxu1 %v2488_v41 }
  0x42   :  { %1650 = vmatpush1.bf16.msra.mxu0 %v2481_v39 }
  0x43   :  { %1684 = vmatprep.subr.bf16.mxu0 %v2223_v4 }
  0x44   :  { %1682 = vmatpush1.bf16.msra.mxu1 %v2498_v47 }
  0x45   :  { %1716 = vmatprep.subr.bf16.mxu1 %v2275_v22 }
  0xf8   :  { %v148_v51 = vpop.f32.mrb[0].mxu0 }
  0xf9   :  { %v224_v53 = vadd.f32 %v148_v51, %v14_v49  ;;  %v150_v54 = vpop.f32.mrb[1].mxu0  ;;  %v1507_v49 = vld [vmem:[%s2866_s0 + $0x28] sm:$0xff] }
  0xfa   :  { %v225_v56 = vadd.f32 %v150_v54, %v15_v50  ;;  %v219_v61 = vpop.f32.mrb[0].mxu1 }
  0xfb   :  { %v1503_v57 = vmul.f32 -1.442695, %v224_v53  ;;  %v221_v63 = vpop.f32.mrb[1].mxu1  ;;  %v226_v6 = vadd.f32 %v219_v61, %v16_v2  ;;  %v1509_v61 = vld [vmem:[%s2866_s0 + $0x38] sm:$0xff] }
  0xfc   :  { %v1504_v59 = vmul.f32 -1.442695, %v225_v56  ;;  %v227_v1 = vadd.f32 %v221_v63, %v17_v60 }
  0xfd   :  { %2068 = vpow2.f32 %v1503_v57 }
  0xfe   :  { %2070 = vpow2.f32 %v1504_v59  ;;  %v1505_v5 = vmul.f32 -1.442695, %v227_v1  ;;  %v1508_v1 = vld [vmem:[%s2866_s0 + $0x30] sm:$0xff] }
 0x100   :  { %2072 = vpow2.f32 %v1505_v5 }
 0x101   :  { %2074 = vtanh.f32 %v226_v6 }
 0x107   :  { %v2069_v11 = vpop.eup %2068 }
 0x108   :  { %v2071_v12 = vpop.eup %2070  ;;  %v231_v13 = vadd.f32 1.0, %v2069_v11 }
 0x109   :  { %v237_v16 = vadd.f32 1.0, %v2071_v12 }
 0x10a   :  { %2076 = vrcp.f32 %v231_v13  ;;  %v2073_v19 = vpop.eup %2072 }
 0x10b   :  { %2078 = vrcp.f32 %v237_v16  ;;  %v2075_v20 = vpop.eup %2074  ;;  %v244_v23 = vadd.f32 1.0, %v2073_v19 }
 0x10d   :  { %2080 = vrcp.f32 %v244_v23 }
 0x114   :  { %v2077_v21 = vpop.eup %2076 }
 0x115   :  { %v2079_v28 = vpop.eup %2078  ;;  %v248_v29 = vmul.f32 %v2077_v21, %v2075_v20 }
 0x116   :  { %v247_v34 = vmul.f32 0.0, %v2079_v28 }
 0x117   :  { %v2081_v36 = vpop.eup %2080 }
 0x118   :  { %v2552_v35 = vadd.f32 %v248_v29, %v247_v34 }
 0x11a   :  { %2082 = vtanh.f32 %v2552_v35 }
 0x124   :  { %v2083_v38 = vpop.eup %2082 }
 0x125   :  { %v251_v43 = vmul.f32 %v2083_v38, %v2081_v36 }
 0x127   :  { %324 = vmatmul.mubr.f32.vlgmr.msra.gmra.mrb[2].mxu0 %v251_v43  ;;  %395 = vmatmul.mubr.f32.vlgmr.msra.gmra.mrb[2].mxu1 %v251_v43 }
 0x128   :  { %1686 = vmatpush1.bf16.msra.mxu0 %v2234_v8  ;;  %1718 = vmatpush1.bf16.msra.mxu1 %v2283_v25 }
 0x129   :  { %1688 = vmatprep.subr.bf16.mxu0 %v2236_v9  ;;  %1720 = vmatprep.subr.bf16.mxu1 %v2308_v33 }
 0x12a   :  { %500 = vmatprep.mubr.f32.mxu0 %v2196_v3  ;;  %571 = vmatprep.mubr.f32.mxu1 %v2196_v3 }
 0x12c   :  { %1690 = vmatpush1.bf16.msra.mxu0 %v2252_v14  ;;  %1722 = vmatpush1.bf16.msra.mxu1 %v2319_v37 }
 0x12d   :  { %1692 = vmatprep.subr.bf16.mxu0 %v2261_v17  ;;  %1724 = vmatprep.subr.bf16.mxu1 %v2343_v45 }
 0x130   :  { %1694 = vmatpush1.bf16.msra.mxu0 %v2286_v26  ;;  %1726 = vmatpush1.bf16.msra.mxu1 %v2352_v48 }
 0x131   :  { %1696 = vmatprep.subr.bf16.mxu0 %v2299_v30  ;;  %1728 = vmatprep.subr.bf16.mxu1 %v2364_v52 }
 0x134   :  { %1698 = vmatpush1.bf16.msra.mxu0 %v2335_v42  ;;  %1730 = vmatpush1.bf16.msra.mxu1 %v2394_v62 }
 0x135   :  { %1700 = vmatprep.subr.bf16.mxu0 %v2346_v46  ;;  %1732 = vmatprep.subr.bf16.mxu1 %v2400_v0 }
 0x138   :  { %1702 = vmatpush1.bf16.msra.mxu0 %v2373_v55  ;;  %1734 = vmatpush1.bf16.msra.mxu1 %v2430_v15 }
 0x139   :  { %1704 = vmatprep.subr.bf16.mxu0 %v2382_v58  ;;  %1736 = vmatprep.subr.bf16.mxu1 %v2436_v18 }
 0x13c   :  { %1706 = vmatpush1.bf16.msra.mxu0 %v2415_v7  ;;  %1738 = vmatpush1.bf16.msra.mxu1 %v2463_v31 }
 0x13d   :  { %1708 = vmatprep.subr.bf16.mxu0 %v2418_v10  ;;  %1740 = vmatprep.subr.bf16.mxu1 %v2466_v32 }
 0x140   :  { %1710 = vmatpush1.bf16.msra.mxu0 %v2451_v24  ;;  %1742 = vmatpush1.bf16.msra.mxu1 %v2485_v40 }
 0x141   :  { %1712 = vmatprep.subr.bf16.mxu0 %v2454_v27  ;;  %1744 = vmatprep.subr.bf16.mxu1 %v2488_v41 }
 0x144   :  { %1714 = vmatpush1.bf16.msra.mxu0 %v2481_v39  ;;  %1746 = vmatpush1.bf16.msra.mxu1 %v2498_v47 }
 0x145   :  { %1748 = vmatprep.subr.bf16.mxu0 %v2223_v4  ;;  %1780 = vmatprep.subr.bf16.mxu1 %v2275_v22 }
 0x1fa   :  { %v325_v50 = vpop.f32.mrb[2].mxu0  ;;  %v396_v51 = vpop.f32.mrb[2].mxu1 }
 0x1fb   :  { %v401_v53 = vadd.f32 %v1506_v44, %v325_v50  ;;  %v327_v54 = vpop.f32.mrb[3].mxu0  ;;  %v398_v56 = vpop.f32.mrb[3].mxu1  ;;  %v403_v5 = vadd.f32 %v1508_v1, %v396_v51  ;;  %v1514_v44 = vld [vmem:[%s2866_s0 + $0x48] sm:$0xff] }
 0x1fc   :  { %v402_v57 = vadd.f32 %v1507_v49, %v327_v54  ;;  %v404_v63 = vadd.f32 %v1509_v61, %v398_v56 }
 0x1fd   :  { %v1510_v59 = vmul.f32 -1.442695, %v401_v53 }
 0x1fe   :  { %v1511_v60 = vmul.f32 -1.442695, %v402_v57  ;;  %v1512_v2 = vmul.f32 -1.442695, %v404_v63  ;;  %v1515_v63 = vld [vmem:[%s2866_s0 + $0x50] sm:$0xff] }
 0x1ff   :  { %2084 = vpow2.f32 %v1510_v59 }
 0x200   :  { %2086 = vpow2.f32 %v1511_v60  ;;  %v1516_v60 = vld [vmem:[%s2866_s0 + $0x58] sm:$0xff] }
 0x201   :  { %2088 = vpow2.f32 %v1512_v2 }
 0x202   :  { %2090 = vtanh.f32 %v403_v5 }
 0x209   :  { %v2085_v6 = vpop.eup %2084 }
 0x20a   :  { %v2087_v11 = vpop.eup %2086  ;;  %v408_v12 = vadd.f32 1.0, %v2085_v6 }
 0x20b   :  { %v414_v13 = vadd.f32 1.0, %v2087_v11  ;;  %v2089_v16 = vpop.eup %2088 }
 0x20c   :  { %2092 = vrcp.f32 %v408_v12  ;;  %v2091_v19 = vpop.eup %2090  ;;  %v421_v28 = vadd.f32 1.0, %v2089_v16 }
 0x20d   :  { %2094 = vrcp.f32 %v414_v13 }
 0x20e   :  { %2096 = vrcp.f32 %v421_v28 }
 0x216   :  { %v2093_v20 = vpop.eup %2092 }
 0x217   :  { %v2095_v21 = vpop.eup %2094  ;;  %v425_v23 = vmul.f32 %v2093_v20, %v2091_v19 }
 0x218   :  { %v424_v29 = vmul.f32 %v2095_v21, %v2552_v35  ;;  %v2097_v36 = vpop.eup %2096  ;;  %v1513_v35 = vld [vmem:[%s2866_s0 + $0x40] sm:$0xff] }
 0x21a   :  { %v2602_v34 = vadd.f32 %v425_v23, %v424_v29 }
 0x21c   :  { %2098 = vtanh.f32 %v2602_v34 }
 0x226   :  { %v2099_v38 = vpop.eup %2098 }
 0x227   :  { %v428_v43 = vmul.f32 %v2099_v38, %v2097_v36 }
 0x229   :  { %501 = vmatmul.mubr.f32.vlgmr.msra.gmra.mrb[4].mxu0 %v428_v43  ;;  %572 = vmatmul.mubr.f32.vlgmr.msra.gmra.mrb[4].mxu1 %v428_v43 }
 0x22a   :  { %1750 = vmatpush1.bf16.msra.mxu0 %v2234_v8  ;;  %1782 = vmatpush1.bf16.msra.mxu1 %v2283_v25 }
 0x22b   :  { %1752 = vmatprep.subr.bf16.mxu0 %v2236_v9  ;;  %1784 = vmatprep.subr.bf16.mxu1 %v2308_v33 }
 0x22c   :  { %677 = vmatprep.mubr.f32.mxu0 %v2196_v3  ;;  %748 = vmatprep.mubr.f32.mxu1 %v2196_v3 }
 0x22e   :  { %1754 = vmatpush1.bf16.msra.mxu0 %v2252_v14  ;;  %1786 = vmatpush1.bf16.msra.mxu1 %v2319_v37 }
 0x22f   :  { %1756 = vmatprep.subr.bf16.mxu0 %v2261_v17  ;;  %1788 = vmatprep.subr.bf16.mxu1 %v2343_v45 }
 0x232   :  { %1758 = vmatpush1.bf16.msra.mxu0 %v2286_v26  ;;  %1790 = vmatpush1.bf16.msra.mxu1 %v2352_v48 }
 0x233   :  { %1760 = vmatprep.subr.bf16.mxu0 %v2299_v30  ;;  %1792 = vmatprep.subr.bf16.mxu1 %v2364_v52 }
 0x236   :  { %1762 = vmatpush1.bf16.msra.mxu0 %v2335_v42  ;;  %1794 = vmatpush1.bf16.msra.mxu1 %v2394_v62 }
 0x237   :  { %1764 = vmatprep.subr.bf16.mxu0 %v2346_v46  ;;  %1796 = vmatprep.subr.bf16.mxu1 %v2400_v0 }
 0x23a   :  { %1766 = vmatpush1.bf16.msra.mxu0 %v2373_v55  ;;  %1798 = vmatpush1.bf16.msra.mxu1 %v2430_v15 }
 0x23b   :  { %1768 = vmatprep.subr.bf16.mxu0 %v2382_v58  ;;  %1800 = vmatprep.subr.bf16.mxu1 %v2436_v18 }
 0x23e   :  { %1770 = vmatpush1.bf16.msra.mxu0 %v2415_v7  ;;  %1802 = vmatpush1.bf16.msra.mxu1 %v2463_v31 }
 0x23f   :  { %1772 = vmatprep.subr.bf16.mxu0 %v2418_v10  ;;  %1804 = vmatprep.subr.bf16.mxu1 %v2466_v32 }
 0x242   :  { %1774 = vmatpush1.bf16.msra.mxu0 %v2451_v24  ;;  %1806 = vmatpush1.bf16.msra.mxu1 %v2485_v40 }
 0x243   :  { %1776 = vmatprep.subr.bf16.mxu0 %v2454_v27  ;;  %1808 = vmatprep.subr.bf16.mxu1 %v2488_v41 }
 0x246   :  { %1778 = vmatpush1.bf16.msra.mxu0 %v2481_v39  ;;  %1810 = vmatpush1.bf16.msra.mxu1 %v2498_v47 }
 0x247   :  { %1812 = vmatprep.subr.bf16.mxu0 %v2223_v4  ;;  %1844 = vmatprep.subr.bf16.mxu1 %v2275_v22 }
 0x2fc   :  { %v502_v49 = vpop.f32.mrb[4].mxu0  ;;  %v573_v50 = vpop.f32.mrb[4].mxu1 }
 0x2fd   :  { %v578_v51 = vadd.f32 %v1513_v35, %v502_v49  ;;  %v504_v53 = vpop.f32.mrb[5].mxu0  ;;  %v575_v54 = vpop.f32.mrb[5].mxu1  ;;  %v580_v2 = vadd.f32 %v1515_v63, %v573_v50  ;;  %v1521_v35 = vld [vmem:[%s2866_s0 + $0x68] sm:$0xff] }
 0x2fe   :  { %v579_v56 = vadd.f32 %v1514_v44, %v504_v53  ;;  %v581_v61 = vadd.f32 %v1516_v60, %v575_v54 }
 0x2ff   :  { %v1517_v57 = vmul.f32 -1.442695, %v578_v51 }
 0x300   :  { %v1518_v59 = vmul.f32 -1.442695, %v579_v56  ;;  %v1519_v1 = vmul.f32 -1.442695, %v581_v61  ;;  %v1522_v61 = vld [vmem:[%s2866_s0 + $0x70] sm:$0xff] }
 0x301   :  { %2100 = vpow2.f32 %v1517_v57 }
 0x302   :  { %2102 = vpow2.f32 %v1518_v59  ;;  %v1523_v59 = vld [vmem:[%s2866_s0 + $0x78] sm:$0xff] }
 0x303   :  { %2104 = vpow2.f32 %v1519_v1 }
 0x304   :  { %2106 = vtanh.f32 %v580_v2 }
 0x30b   :  { %v2101_v5 = vpop.eup %2100 }
 0x30c   :  { %v2103_v6 = vpop.eup %2102  ;;  %v585_v11 = vadd.f32 1.0, %v2101_v5 }
 0x30d   :  { %v591_v12 = vadd.f32 1.0, %v2103_v6  ;;  %v2105_v13 = vpop.eup %2104 }
 0x30e   :  { %2108 = vrcp.f32 %v585_v11  ;;  %v2107_v16 = vpop.eup %2106  ;;  %v598_v23 = vadd.f32 1.0, %v2105_v13 }
 0x30f   :  { %2110 = vrcp.f32 %v591_v12 }
 0x310   :  { %2112 = vrcp.f32 %v598_v23 }
 0x318   :  { %v2109_v19 = vpop.eup %2108 }
 0x319   :  { %v2111_v20 = vpop.eup %2110  ;;  %v602_v21 = vmul.f32 %v2109_v19, %v2107_v16 }
 0x31a   :  { %v601_v28 = vmul.f32 %v2111_v20, %v2602_v34  ;;  %v2113_v36 = vpop.eup %2112  ;;  %v1520_v34 = vld [vmem:[%s2866_s0 + $0x60] sm:$0xff] }
 0x31c   :  { %v2652_v29 = vadd.f32 %v602_v21, %v601_v28 }
 0x31e   :  { %2114 = vtanh.f32 %v2652_v29 }
 0x328   :  { %v2115_v38 = vpop.eup %2114 }
 0x329   :  { %v605_v43 = vmul.f32 %v2115_v38, %v2113_v36 }
 0x32b   :  { %678 = vmatmul.mubr.f32.vlgmr.msra.gmra.mrb[6].mxu0 %v605_v43  ;;  %749 = vmatmul.mubr.f32.vlgmr.msra.gmra.mrb[6].mxu1 %v605_v43 }
 0x32c   :  { %1814 = vmatpush1.bf16.msra.mxu0 %v2234_v8  ;;  %1846 = vmatpush1.bf16.msra.mxu1 %v2283_v25 }
 0x32d   :  { %1816 = vmatprep.subr.bf16.mxu0 %v2236_v9  ;;  %1848 = vmatprep.subr.bf16.mxu1 %v2308_v33 }
 0x32e   :  { %854 = vmatprep.mubr.f32.mxu0 %v2196_v3  ;;  %925 = vmatprep.mubr.f32.mxu1 %v2196_v3 }
 0x330   :  { %1818 = vmatpush1.bf16.msra.mxu0 %v2252_v14  ;;  %1850 = vmatpush1.bf16.msra.mxu1 %v2319_v37 }
 0x331   :  { %1820 = vmatprep.subr.bf16.mxu0 %v2261_v17  ;;  %1852 = vmatprep.subr.bf16.mxu1 %v2343_v45 }
 0x334   :  { %1822 = vmatpush1.bf16.msra.mxu0 %v2286_v26  ;;  %1854 = vmatpush1.bf16.msra.mxu1 %v2352_v48 }
 0x335   :  { %1824 = vmatprep.subr.bf16.mxu0 %v2299_v30  ;;  %1856 = vmatprep.subr.bf16.mxu1 %v2364_v52 }
 0x338   :  { %1826 = vmatpush1.bf16.msra.mxu0 %v2335_v42  ;;  %1858 = vmatpush1.bf16.msra.mxu1 %v2394_v62 }
 0x339   :  { %1828 = vmatprep.subr.bf16.mxu0 %v2346_v46  ;;  %1860 = vmatprep.subr.bf16.mxu1 %v2400_v0 }
 0x33c   :  { %1830 = vmatpush1.bf16.msra.mxu0 %v2373_v55  ;;  %1862 = vmatpush1.bf16.msra.mxu1 %v2430_v15 }
 0x33d   :  { %1832 = vmatprep.subr.bf16.mxu0 %v2382_v58  ;;  %1864 = vmatprep.subr.bf16.mxu1 %v2436_v18 }
 0x340   :  { %1834 = vmatpush1.bf16.msra.mxu0 %v2415_v7  ;;  %1866 = vmatpush1.bf16.msra.mxu1 %v2463_v31 }
 0x341   :  { %1836 = vmatprep.subr.bf16.mxu0 %v2418_v10  ;;  %1868 = vmatprep.subr.bf16.mxu1 %v2466_v32 }
 0x344   :  { %1838 = vmatpush1.bf16.msra.mxu0 %v2451_v24  ;;  %1870 = vmatpush1.bf16.msra.mxu1 %v2485_v40 }
 0x345   :  { %1840 = vmatprep.subr.bf16.mxu0 %v2454_v27  ;;  %1872 = vmatprep.subr.bf16.mxu1 %v2488_v41 }
 0x348   :  { %1842 = vmatpush1.bf16.msra.mxu0 %v2481_v39  ;;  %1874 = vmatpush1.bf16.msra.mxu1 %v2498_v47 }
 0x349   :  { %1876 = vmatprep.subr.bf16.mxu0 %v2223_v4  ;;  %1908 = vmatprep.subr.bf16.mxu1 %v2275_v22 }
 0x3fe   :  { %v679_v44 = vpop.f32.mrb[6].mxu0  ;;  %v750_v49 = vpop.f32.mrb[6].mxu1 }
 0x3ff   :  { %v755_v50 = vadd.f32 %v1520_v34, %v679_v44  ;;  %v681_v51 = vpop.f32.mrb[7].mxu0  ;;  %v752_v53 = vpop.f32.mrb[7].mxu1  ;;  %v757_v1 = vadd.f32 %v1522_v61, %v750_v49  ;;  %v1528_v34 = vld [vmem:[%s2866_s0 + $0x88] sm:$0xff] }
 0x400   :  { %v756_v54 = vadd.f32 %v1521_v35, %v681_v51  ;;  %v758_v60 = vadd.f32 %v1523_v59, %v752_v53 }
 0x401   :  { %v1524_v56 = vmul.f32 -1.442695, %v755_v50 }
 0x402   :  { %v1525_v57 = vmul.f32 -1.442695, %v756_v54  ;;  %v1526_v63 = vmul.f32 -1.442695, %v758_v60  ;;  %v1529_v60 = vld [vmem:[%s2866_s0 + $0x90] sm:$0xff] }
 0x403   :  { %2116 = vpow2.f32 %v1524_v56 }
 0x404   :  { %2118 = vpow2.f32 %v1525_v57  ;;  %v1530_v57 = vld [vmem:[%s2866_s0 + $0x98] sm:$0xff] }
 0x405   :  { %2120 = vpow2.f32 %v1526_v63 }
 0x406   :  { %2122 = vtanh.f32 %v757_v1 }
 0x40d   :  { %v2117_v2 = vpop.eup %2116 }
 0x40e   :  { %v2119_v5 = vpop.eup %2118  ;;  %v762_v6 = vadd.f32 1.0, %v2117_v2 }
 0x40f   :  { %v768_v11 = vadd.f32 1.0, %v2119_v5  ;;  %v2121_v12 = vpop.eup %2120 }
 0x410   :  { %2124 = vrcp.f32 %v762_v6  ;;  %v2123_v13 = vpop.eup %2122  ;;  %v775_v21 = vadd.f32 1.0, %v2121_v12 }
 0x411   :  { %2126 = vrcp.f32 %v768_v11 }
 0x412   :  { %2128 = vrcp.f32 %v775_v21 }
 0x41a   :  { %v2125_v16 = vpop.eup %2124 }
 0x41b   :  { %v2127_v19 = vpop.eup %2126  ;;  %v779_v20 = vmul.f32 %v2125_v16, %v2123_v13 }
 0x41c   :  { %v778_v23 = vmul.f32 %v2127_v19, %v2652_v29  ;;  %v2129_v36 = vpop.eup %2128  ;;  %v1527_v29 = vld [vmem:[%s2866_s0 + $0x80] sm:$0xff] }
 0x41e   :  { %v2702_v28 = vadd.f32 %v779_v20, %v778_v23 }
 0x420   :  { %2130 = vtanh.f32 %v2702_v28 }
 0x42a   :  { %v2131_v38 = vpop.eup %2130 }
 0x42b   :  { %v782_v43 = vmul.f32 %v2131_v38, %v2129_v36 }
 0x42d   :  { %855 = vmatmul.mubr.f32.vlgmr.msra.gmra.mrb[8].mxu0 %v782_v43  ;;  %926 = vmatmul.mubr.f32.vlgmr.msra.gmra.mrb[8].mxu1 %v782_v43 }
 0x42e   :  { %1878 = vmatpush1.bf16.msra.mxu0 %v2234_v8  ;;  %1910 = vmatpush1.bf16.msra.mxu1 %v2283_v25 }
 0x42f   :  { %1880 = vmatprep.subr.bf16.mxu0 %v2236_v9  ;;  %1912 = vmatprep.subr.bf16.mxu1 %v2308_v33 }
 0x430   :  { %1031 = vmatprep.mubr.f32.mxu0 %v2196_v3  ;;  %1102 = vmatprep.mubr.f32.mxu1 %v2196_v3 }
 0x432   :  { %1882 = vmatpush1.bf16.msra.mxu0 %v2252_v14  ;;  %1914 = vmatpush1.bf16.msra.mxu1 %v2319_v37 }
 0x433   :  { %1884 = vmatprep.subr.bf16.mxu0 %v2261_v17  ;;  %1916 = vmatprep.subr.bf16.mxu1 %v2343_v45 }
 0x436   :  { %1886 = vmatpush1.bf16.msra.mxu0 %v2286_v26  ;;  %1918 = vmatpush1.bf16.msra.mxu1 %v2352_v48 }
 0x437   :  { %1888 = vmatprep.subr.bf16.mxu0 %v2299_v30  ;;  %1920 = vmatprep.subr.bf16.mxu1 %v2364_v52 }
 0x43a   :  { %1890 = vmatpush1.bf16.msra.mxu0 %v2335_v42  ;;  %1922 = vmatpush1.bf16.msra.mxu1 %v2394_v62 }
 0x43b   :  { %1892 = vmatprep.subr.bf16.mxu0 %v2346_v46  ;;  %1924 = vmatprep.subr.bf16.mxu1 %v2400_v0 }
 0x43e   :  { %1894 = vmatpush1.bf16.msra.mxu0 %v2373_v55  ;;  %1926 = vmatpush1.bf16.msra.mxu1 %v2430_v15 }
 0x43f   :  { %1896 = vmatprep.subr.bf16.mxu0 %v2382_v58  ;;  %1928 = vmatprep.subr.bf16.mxu1 %v2436_v18 }
 0x442   :  { %1898 = vmatpush1.bf16.msra.mxu0 %v2415_v7  ;;  %1930 = vmatpush1.bf16.msra.mxu1 %v2463_v31 }
 0x443   :  { %1900 = vmatprep.subr.bf16.mxu0 %v2418_v10  ;;  %1932 = vmatprep.subr.bf16.mxu1 %v2466_v32 }
 0x446   :  { %1902 = vmatpush1.bf16.msra.mxu0 %v2451_v24  ;;  %1934 = vmatpush1.bf16.msra.mxu1 %v2485_v40 }
 0x447   :  { %1904 = vmatprep.subr.bf16.mxu0 %v2454_v27  ;;  %1936 = vmatprep.subr.bf16.mxu1 %v2488_v41 }
 0x44a   :  { %1906 = vmatpush1.bf16.msra.mxu0 %v2481_v39  ;;  %1938 = vmatpush1.bf16.msra.mxu1 %v2498_v47 }
 0x44b   :  { %1940 = vmatprep.subr.bf16.mxu0 %v2223_v4  ;;  %1972 = vmatprep.subr.bf16.mxu1 %v2275_v22 }
 0x500   :  { %v856_v35 = vpop.f32.mrb[8].mxu0  ;;  %v927_v44 = vpop.f32.mrb[8].mxu1 }
 0x501   :  { %v932_v49 = vadd.f32 %v1527_v29, %v856_v35  ;;  %v858_v50 = vpop.f32.mrb[9].mxu0  ;;  %v929_v51 = vpop.f32.mrb[9].mxu1  ;;  %v934_v63 = vadd.f32 %v1529_v60, %v927_v44  ;;  %v1535_v29 = vld [vmem:[%s2866_s0 + $0xa8] sm:$0xff] }
 0x502   :  { %v933_v53 = vadd.f32 %v1528_v34, %v858_v50  ;;  %v935_v59 = vadd.f32 %v1530_v57, %v929_v51 }
 0x503   :  { %v1531_v54 = vmul.f32 -1.442695, %v932_v49 }
 0x504   :  { %v1532_v56 = vmul.f32 -1.442695, %v933_v53  ;;  %v1533_v61 = vmul.f32 -1.442695, %v935_v59 }
 0x505   :  { %2132 = vpow2.f32 %v1531_v54 }
 0x506   :  { %2134 = vpow2.f32 %v1532_v56  ;;  %v1536_v56 = vld [vmem:[%s2866_s0 + $0xb0] sm:$0xff] }
 0x507   :  { %2136 = vpow2.f32 %v1533_v61 }
 0x508   :  { %2138 = vtanh.f32 %v934_v63 }
 0x50f   :  { %v2133_v1 = vpop.eup %2132 }
 0x510   :  { %v2135_v2 = vpop.eup %2134  ;;  %v939_v5 = vadd.f32 1.0, %v2133_v1 }
 0x511   :  { %v945_v6 = vadd.f32 1.0, %v2135_v2  ;;  %v2137_v11 = vpop.eup %2136 }
 0x512   :  { %2140 = vrcp.f32 %v939_v5  ;;  %v2139_v12 = vpop.eup %2138  ;;  %v952_v20 = vadd.f32 1.0, %v2137_v11 }
 0x513   :  { %2142 = vrcp.f32 %v945_v6 }
 0x514   :  { %2144 = vrcp.f32 %v952_v20 }
 0x51c   :  { %v2141_v13 = vpop.eup %2140 }
 0x51d   :  { %v2143_v16 = vpop.eup %2142  ;;  %v956_v19 = vmul.f32 %v2141_v13, %v2139_v12 }
 0x51e   :  { %v955_v21 = vmul.f32 %v2143_v16, %v2702_v28  ;;  %v2145_v36 = vpop.eup %2144  ;;  %v1534_v28 = vld [vmem:[%s2866_s0 + $0xa0] sm:$0xff] }
 0x520   :  { %v2752_v23 = vadd.f32 %v956_v19, %v955_v21 }
 0x522   :  { %2146 = vtanh.f32 %v2752_v23 }
 0x52c   :  { %v2147_v38 = vpop.eup %2146 }
 0x52d   :  { %v959_v43 = vmul.f32 %v2147_v38, %v2145_v36 }
 0x52f   :  { %1032 = vmatmul.mubr.f32.vlgmr.msra.gmra.mrb[10].mxu0 %v959_v43  ;;  %1103 = vmatmul.mubr.f32.vlgmr.msra.gmra.mrb[10].mxu1 %v959_v43 }
 0x530   :  { %1942 = vmatpush1.bf16.msra.mxu0 %v2234_v8  ;;  %1974 = vmatpush1.bf16.msra.mxu1 %v2283_v25 }
 0x531   :  { %1944 = vmatprep.subr.bf16.mxu0 %v2236_v9  ;;  %1976 = vmatprep.subr.bf16.mxu1 %v2308_v33 }
 0x532   :  { %1208 = vmatprep.mubr.f32.mxu0 %v2196_v3  ;;  %1279 = vmatprep.mubr.f32.mxu1 %v2196_v3 }
 0x534   :  { %1946 = vmatpush1.bf16.msra.mxu0 %v2252_v14  ;;  %1978 = vmatpush1.bf16.msra.mxu1 %v2319_v37 }
 0x535   :  { %1948 = vmatprep.subr.bf16.mxu0 %v2261_v17  ;;  %1980 = vmatprep.subr.bf16.mxu1 %v2343_v45 }
 0x538   :  { %1950 = vmatpush1.bf16.msra.mxu0 %v2286_v26  ;;  %1982 = vmatpush1.bf16.msra.mxu1 %v2352_v48 }
 0x539   :  { %1952 = vmatprep.subr.bf16.mxu0 %v2299_v30  ;;  %1984 = vmatprep.subr.bf16.mxu1 %v2364_v52 }
 0x53c   :  { %1954 = vmatpush1.bf16.msra.mxu0 %v2335_v42  ;;  %1986 = vmatpush1.bf16.msra.mxu1 %v2394_v62 }
 0x53d   :  { %1956 = vmatprep.subr.bf16.mxu0 %v2346_v46  ;;  %1988 = vmatprep.subr.bf16.mxu1 %v2400_v0 }
 0x540   :  { %1958 = vmatpush1.bf16.msra.mxu0 %v2373_v55  ;;  %1990 = vmatpush1.bf16.msra.mxu1 %v2430_v15 }
 0x541   :  { %1960 = vmatprep.subr.bf16.mxu0 %v2382_v58  ;;  %1992 = vmatprep.subr.bf16.mxu1 %v2436_v18 }
 0x544   :  { %1962 = vmatpush1.bf16.msra.mxu0 %v2415_v7  ;;  %1994 = vmatpush1.bf16.msra.mxu1 %v2463_v31 }
 0x545   :  { %1964 = vmatprep.subr.bf16.mxu0 %v2418_v10  ;;  %1996 = vmatprep.subr.bf16.mxu1 %v2466_v32 }
 0x548   :  { %1966 = vmatpush1.bf16.msra.mxu0 %v2451_v24  ;;  %1998 = vmatpush1.bf16.msra.mxu1 %v2485_v40 }
 0x549   :  { %1968 = vmatprep.subr.bf16.mxu0 %v2454_v27  ;;  %2000 = vmatprep.subr.bf16.mxu1 %v2488_v41 }
 0x54c   :  { %1970 = vmatpush1.bf16.msra.mxu0 %v2481_v39  ;;  %2002 = vmatpush1.bf16.msra.mxu1 %v2498_v47 }
 0x54d   :  { %2004 = vmatprep.subr.bf16.mxu0 %v2223_v4  ;;  %2036 = vmatprep.subr.bf16.mxu1 %v2275_v22  ;;  %v1537_v4 = vld [vmem:[%s2866_s0 + $0xb8] sm:$0xff] }
 0x602   :  { %v1033_v34 = vpop.f32.mrb[10].mxu0  ;;  %v1104_v35 = vpop.f32.mrb[10].mxu1 }
 0x603   :  { %v1109_v44 = vadd.f32 %v1534_v28, %v1033_v34  ;;  %v1035_v49 = vpop.f32.mrb[11].mxu0  ;;  %v1106_v50 = vpop.f32.mrb[11].mxu1  ;;  %v1111_v59 = vadd.f32 %v1536_v56, %v1104_v35 }
 0x604   :  { %v1110_v51 = vadd.f32 %v1535_v29, %v1035_v49  ;;  %v1112_v22 = vadd.f32 %v1537_v4, %v1106_v50  ;;  %v1551_v50 = vld [vmem:[%s2866_s0 + $0xf8] sm:$0xff] }
 0x605   :  { %v1538_v53 = vmul.f32 -1.442695, %v1109_v44 }
 0x606   :  { %v1539_v54 = vmul.f32 -1.442695, %v1110_v51  ;;  %v1540_v57 = vmul.f32 -1.442695, %v1112_v22 }
 0x607   :  { %2148 = vpow2.f32 %v1538_v53  ;;  %v1550_v53 = vld [vmem:[%s2866_s0 + $0xf0] sm:$0xff] }
 0x608   :  { %2150 = vpow2.f32 %v1539_v54 }
 0x609   :  { %2152 = vpow2.f32 %v1540_v57 }
 0x60a   :  { %2154 = vtanh.f32 %v1111_v59 }
 0x611   :  { %v2149_v60 = vpop.eup %2148 }
 0x612   :  { %v2151_v61 = vpop.eup %2150  ;;  %v1116_v63 = vadd.f32 1.0, %v2149_v60 }
 0x613   :  { %v1122_v1 = vadd.f32 1.0, %v2151_v61  ;;  %v2153_v2 = vpop.eup %2152 }
 0x614   :  { %2156 = vrcp.f32 %v1116_v63  ;;  %v2155_v5 = vpop.eup %2154  ;;  %v1129_v13 = vadd.f32 1.0, %v2153_v2 }
 0x615   :  { %2158 = vrcp.f32 %v1122_v1 }
 0x616   :  { %2160 = vrcp.f32 %v1129_v13 }
 0x61e   :  { %v2157_v6 = vpop.eup %2156 }
 0x61f   :  { %v2159_v11 = vpop.eup %2158  ;;  %v1133_v12 = vmul.f32 %v2157_v6, %v2155_v5 }
 0x620   :  { %v1132_v16 = vmul.f32 %v2159_v11, %v2752_v23  ;;  %v2161_v20 = vpop.eup %2160  ;;  %v1549_v23 = vld [vmem:[%s2866_s0 + $0xe8] sm:$0xff] }
 0x622   :  { %v2802_v19 = vadd.f32 %v1133_v12, %v1132_v16 }
 0x624   :  { %2162 = vtanh.f32 %v2802_v19 }
 0x62e   :  { %v2163_v21 = vpop.eup %2162 }
 0x62f   :  { %v1136_v36 = vmul.f32 %v2163_v21, %v2161_v20 }
 0x631   :  { %1209 = vmatmul.mubr.f32.vlgmr.msra.gmra.mrb[12].mxu0 %v1136_v36  ;;  %1280 = vmatmul.mubr.f32.vlgmr.msra.gmra.mrb[12].mxu1 %v1136_v36 }
 0x632   :  { %2006 = vmatpush1.bf16.msra.mxu0 %v2234_v8  ;;  %2038 = vmatpush1.bf16.msra.mxu1 %v2283_v25  ;;  %v1542_v8 = vld [vmem:[%s2866_s0 + $0xc8] sm:$0xff] }
 0x633   :  { %2008 = vmatprep.subr.bf16.mxu0 %v2236_v9  ;;  %2040 = vmatprep.subr.bf16.mxu1 %v2308_v33 }
 0x634   :  { %1385 = vmatprep.mubr.f32.mxu0 %v2196_v3  ;;  %1456 = vmatprep.mubr.f32.mxu1 %v2196_v3  ;;  %v1541_v3 = vld [vmem:[%s2866_s0 + $0xc0] sm:$0xff] }
 0x636   :  { %2010 = vmatpush1.bf16.msra.mxu0 %v2252_v14  ;;  %2042 = vmatpush1.bf16.msra.mxu1 %v2319_v37 }
 0x637   :  { %2012 = vmatprep.subr.bf16.mxu0 %v2261_v17  ;;  %2044 = vmatprep.subr.bf16.mxu1 %v2343_v45 }
 0x63a   :  { %2014 = vmatpush1.bf16.msra.mxu0 %v2286_v26  ;;  %2046 = vmatpush1.bf16.msra.mxu1 %v2352_v48 }
 0x63b   :  { %2016 = vmatprep.subr.bf16.mxu0 %v2299_v30  ;;  %2048 = vmatprep.subr.bf16.mxu1 %v2364_v52 }
 0x63e   :  { %2018 = vmatpush1.bf16.msra.mxu0 %v2335_v42  ;;  %2050 = vmatpush1.bf16.msra.mxu1 %v2394_v62  ;;  %v1544_v42 = vld [vmem:[%s2866_s0 + $0xd8] sm:$0xff] }
 0x63f   :  { %2020 = vmatprep.subr.bf16.mxu0 %v2346_v46  ;;  %2052 = vmatprep.subr.bf16.mxu1 %v2400_v0  ;;  %v1543_v46 = vld [vmem:[%s2866_s0 + $0xd0] sm:$0xff] }
 0x642   :  { %2022 = vmatpush1.bf16.msra.mxu0 %v2373_v55  ;;  %2054 = vmatpush1.bf16.msra.mxu1 %v2430_v15 }
 0x643   :  { %2024 = vmatprep.subr.bf16.mxu0 %v2382_v58  ;;  %2056 = vmatprep.subr.bf16.mxu1 %v2436_v18 }
 0x646   :  { %2026 = vmatpush1.bf16.msra.mxu0 %v2415_v7  ;;  %2058 = vmatpush1.bf16.msra.mxu1 %v2463_v31 }
 0x647   :  { %2028 = vmatprep.subr.bf16.mxu0 %v2418_v10  ;;  %2060 = vmatprep.subr.bf16.mxu1 %v2466_v32 }
 0x64a   :  { %2030 = vmatpush1.bf16.msra.mxu0 %v2451_v24  ;;  %2062 = vmatpush1.bf16.msra.mxu1 %v2485_v40 }
 0x64b   :  { %2032 = vmatprep.subr.bf16.mxu0 %v2454_v27  ;;  %2064 = vmatprep.subr.bf16.mxu1 %v2488_v41 }
 0x64e   :  { %2034 = vmatpush1.bf16.msra.mxu0 %v2481_v39  ;;  %2066 = vmatpush1.bf16.msra.mxu1 %v2498_v47  ;;  %v1548_v47 = vld [vmem:[%s2866_s0 + $0xe0] sm:$0xff] }
 0x704   :  { %v1210_v9 = vpop.f32.mrb[12].mxu0  ;;  %v1281_v14 = vpop.f32.mrb[12].mxu1 }
 0x705   :  { %v1286_v17 = vadd.f32 %v1541_v3, %v1210_v9  ;;  %v1212_v25 = vpop.f32.mrb[13].mxu0  ;;  %v1283_v26 = vpop.f32.mrb[13].mxu1  ;;  %v1288_v52 = vadd.f32 %v1543_v46, %v1281_v14 }
 0x706   :  { %v1287_v30 = vadd.f32 %v1542_v8, %v1212_v25  ;;  %v1289_v45 = vadd.f32 %v1544_v42, %v1283_v26 }
 0x707   :  { %v1545_v33 = vmul.f32 -1.442695, %v1286_v17 }
 0x708   :  { %v1546_v37 = vmul.f32 -1.442695, %v1287_v30  ;;  %v1547_v48 = vmul.f32 -1.442695, %v1289_v45 }
 0x709   :  { %2164 = vpow2.f32 %v1545_v33 }
 0x70a   :  { %2166 = vpow2.f32 %v1546_v37 }
 0x70b   :  { %2168 = vpow2.f32 %v1547_v48 }
 0x70c   :  { %2170 = vtanh.f32 %v1288_v52 }
 0x713   :  { %v2165_v55 = vpop.eup %2164 }
 0x714   :  { %v2167_v58 = vpop.eup %2166  ;;  %v1293_v62 = vadd.f32 1.0, %v2165_v55 }
 0x715   :  { %v1299_v0 = vadd.f32 1.0, %v2167_v58  ;;  %v2169_v7 = vpop.eup %2168 }
 0x716   :  { %2172 = vrcp.f32 %v1293_v62  ;;  %v2171_v10 = vpop.eup %2170  ;;  %v1306_v27 = vadd.f32 1.0, %v2169_v7 }
 0x717   :  { %2174 = vrcp.f32 %v1299_v0 }
 0x718   :  { %2176 = vrcp.f32 %v1306_v27 }
 0x720   :  { %v2173_v15 = vpop.eup %2172 }
 0x721   :  { %v2175_v18 = vpop.eup %2174  ;;  %v1310_v24 = vmul.f32 %v2173_v15, %v2171_v10 }
 0x722   :  { %v1309_v31 = vmul.f32 %v2175_v18, %v2802_v19  ;;  %v2177_v39 = vpop.eup %2176 }
 0x724   :  { %v1311_v32 = vadd.f32 %v1310_v24, %v1309_v31 }
 0x726   :  { %2178 = vtanh.f32 %v1311_v32 }
 0x730   :  { %v2179_v40 = vpop.eup %2178 }
 0x731   :  { %v1313_v41 = vmul.f32 %v2179_v40, %v2177_v39 }
 0x733   :  { %1386 = vmatmul.mubr.f32.vlgmr.msra.gmra.mrb[14].mxu0 %v1313_v41  ;;  %1457 = vmatmul.mubr.f32.vlgmr.msra.gmra.mrb[14].mxu1 %v1313_v41 }
 0x806   :  { %v1387_v38 = vpop.f32.mrb[14].mxu0  ;;  %v1458_v43 = vpop.f32.mrb[14].mxu1 }
 0x807   :  { %v1463_v28 = vadd.f32 %v1548_v47, %v1387_v38  ;;  %v1389_v29 = vpop.f32.mrb[15].mxu0  ;;  %v1460_v34 = vpop.f32.mrb[15].mxu1  ;;  %v1465_v4 = vadd.f32 %v1550_v53, %v1458_v43 }
 0x808   :  { %v1464_v35 = vadd.f32 %v1549_v23, %v1389_v29  ;;  %v1466_v51 = vadd.f32 %v1551_v50, %v1460_v34 }
 0x809   :  { %v1552_v44 = vmul.f32 -1.442695, %v1463_v28 }
 0x80a   :  { %v1553_v49 = vmul.f32 -1.442695, %v1464_v35  ;;  %v1554_v54 = vmul.f32 -1.442695, %v1466_v51 }
 0x80b   :  { %2180 = vpow2.f32 %v1552_v44 }
 0x80c   :  { %2182 = vpow2.f32 %v1553_v49 }
 0x80d   :  { %2184 = vpow2.f32 %v1554_v54 }
 0x80e   :  { %2186 = vtanh.f32 %v1465_v4 }
 0x815   :  { %v2181_v22 = vpop.eup %2180 }
 0x816   :  { %v2183_v56 = vpop.eup %2182  ;;  %v1470_v57 = vadd.f32 1.0, %v2181_v22 }
 0x817   :  { %v1476_v59 = vadd.f32 1.0, %v2183_v56  ;;  %v2185_v60 = vpop.eup %2184 }
 0x818   :  { %2188 = vrcp.f32 %v1470_v57  ;;  %v2187_v61 = vpop.eup %2186  ;;  %v1483_v5 = vadd.f32 1.0, %v2185_v60 }
 0x819   :  { %2190 = vrcp.f32 %v1476_v59 }
 0x81a   :  { %2192 = vrcp.f32 %v1483_v5 }
 0x822   :  { %v2189_v63 = vpop.eup %2188 }
 0x823   :  { %v2191_v1 = vpop.eup %2190  ;;  %v1487_v2 = vmul.f32 %v2189_v63, %v2187_v61 }
 0x824   :  { %v1486_v6 = vmul.f32 %v2191_v1, %v1311_v32  ;;  %v2193_v12 = vpop.eup %2192 }
 0x826   :  { %v1488_v11 = vadd.f32 %v1487_v2, %v1486_v6 }
 0x828   :  { %2194 = vtanh.f32 %v1488_v11 }
 0x832   :  { %v2195_v13 = vpop.eup %2194 }
 0x833   :  { %v1490_v16 = vmul.f32 %v2195_v13, %v2193_v12 }
 0x835   :  { %1491 = vst [vmem:[%s2867_s2] sm:$0xff] %v1490_v16 }

</bundles_post_ra>
